<compile_context>
chip_gen: v6e
topology: v6e:2x2x1
jax: 0.10.0
libtpu: 0.0.40
codegen_flags: <defaults>
</compile_context>

<pallas_src>
import functools

import jax
import jax.numpy as jnp
from jax.experimental import pallas as pl
from jax.experimental.pallas import tpu as pltpu


def _round_up(x, m):
    return (x + m - 1) // m * m


def _cdiv(a, b):
    return (a + b - 1) // b


# --------------------------------------------------------------------------- #
# Shared conv accumulation: ksz MXU matmuls over sublane-aligned slices of the
# kw-unfolded tile (contraction dim = ksz * C_in), f32 accumulation in VMEM.
# --------------------------------------------------------------------------- #
def _conv_accumulate(x_ref, w_ref, acc_ref, *, ksz, L, step):
    for ki in range(ksz):
        off = ki * step                                   # multiple of 8 (W_out8 | step)
        lhs = x_ref[0, 0, off:off + L, :]                 # (L, K) aligned static slice
        contrib = jnp.dot(lhs, w_ref[ki], preferred_element_type=jnp.float32)
        if ki == 0:
            acc_ref[...] = contrib
        else:
            acc_ref[...] += contrib


# --------------------------------------------------------------------------- #
# Pass 1 (T > 1): conv [+ bias] -> y (compute dtype) + per-tile channel stats.
# --------------------------------------------------------------------------- #
def _conv_stats_kernel(x_ref, w_ref, b_ref, y_ref, stats_ref, acc_ref, *,
                       ksz, step, tile_h, w8, cpad, add_bias, need_stats, h_out):
    L = tile_h * w8
    _conv_accumulate(x_ref, w_ref, acc_ref, ksz=ksz, L=L, step=step)
    y = acc_ref[...]                                      # (L, cpad) f32
    if add_bias:
        y = y + b_ref[...]

    if need_stats:
        ys = y
        if h_out % tile_h != 0:
            # Ragged tail tile: mask the padded output rows out of the sums.
            t = pl.program_id(1)
            fid = jax.lax.broadcasted_iota(jnp.int32, (L, 1), 0)
            ys = jnp.where(fid < (h_out - t * tile_h) * w8, y, 0.0)
        stats_ref[0, 0, 0:1, :] = jnp.sum(ys, axis=0, keepdims=True)
        stats_ref[0, 0, 1:2, :] = jnp.sum(ys * ys, axis=0, keepdims=True)
    else:
        stats_ref[...] = jnp.zeros_like(stats_ref)

    y_ref[0] = y.reshape(tile_h, w8, cpad).astype(y_ref.dtype)


# --------------------------------------------------------------------------- #
# Pass 1 fused (T == 1): conv [+ bias] -> InstanceNorm(affine) -> ReLU.
# --------------------------------------------------------------------------- #
def _conv_fused_kernel(x_ref, w_ref, b_ref, g_ref, be_ref, o_ref, acc_ref, *,
                       ksz, step, tile_h, w8, cpad, add_bias, normalize, relu,
                       inv_p, eps):
    L = tile_h * w8
    _conv_accumulate(x_ref, w_ref, acc_ref, ksz=ksz, L=L, step=step)
    y = acc_ref[...]                                      # (L, cpad) f32
    if add_bias:
        y = y + b_ref[...]
    if normalize:
        # Zero-padded columns contribute 0 to the sums; inv_p = 1/(H_out*W_out).
        mean = jnp.sum(y, axis=0, keepdims=True) * inv_p
        ex2 = jnp.sum(y * y, axis=0, keepdims=True) * inv_p
        var = jnp.maximum(ex2 - mean * mean, 0.0)
        inv = jax.lax.rsqrt(var + eps)
        scale = g_ref[...] * inv
        shift = be_ref[...] - mean * scale
        y = y * scale + shift
    if relu:
        y = jnp.maximum(y, 0.0)
    o_ref[0] = y.reshape(tile_h, w8, cpad).astype(o_ref.dtype)


# --------------------------------------------------------------------------- #
# Pass 2 (T > 1): per-(sample, channel) affine (folded InstanceNorm) + ReLU,
# applied in place over y (input_output_aliases).
# --------------------------------------------------------------------------- #
def _affine_relu_kernel(y_ref, scale_ref, shift_ref, o_ref, *, relu):
    y = y_ref[0].astype(jnp.float32)                      # (tile_h, w8, cpad)
    out = y * scale_ref[...] + shift_ref[...]             # scale/shift: (1, 1, cpad)
    if relu:
        out = jnp.maximum(out, 0.0)
    o_ref[0] = out.astype(o_ref.dtype)


def _reflect_index(pidx, pad, n):
    """ReflectionPad2d index math: padded-axis index -> source index in [0, n)."""
    j = pidx - pad
    j = jnp.where(j < 0, -j, j)
    j = jnp.where(j >= n, 2 * (n - 1) - j, j)
    return jnp.clip(j, 0, n - 1)


# --------------------------------------------------------------------------- #
# Wrapper.
# --------------------------------------------------------------------------- #
@functools.partial(
    jax.jit,
    static_argnames=("kernel_size", "stride", "upsample", "normalize", "relu",
                     "eps", "compute_dtype", "tile_rows", "vmem_budget_bytes"))
def conv_block_forward(x_nchw, weight, bias, gamma=None, beta=None, *,
                       kernel_size, stride=1, upsample=False,
                       normalize=True, relu=True, eps=1e-5,
                       compute_dtype=jnp.bfloat16, tile_rows=None,
                       vmem_budget_bytes=20 * 2**20):
    """ConvBlock forward. x_nchw: (N, C_in, H, W) -> (N, C_out, H_out, W_out) f32."""
    N, C_in, H, W = x_nchw.shape
    C_out = weight.shape[0]
    ksz = int(kernel_size)
    pad = ksz // 2

    H2, W2 = (2 * H, 2 * W) if upsample else (H, W)       # nearest-x2 folded into gather
    Hp, Wp = H2 + 2 * pad, W2 + 2 * pad
    H_out = (Hp - ksz) // stride + 1
    W_out = (Wp - ksz) // stride + 1
    W_out8 = _round_up(W_out, 8)
    Cpad = _round_up(C_out, 128)
    K = ksz * C_in
    c_bytes = jnp.dtype(compute_dtype).itemsize

    # ---- byte-budgeted row tile (no divisibility constraint; ragged tail ok) ---
    def est_bytes(th):
        Lt = th * W_out8
        r_rows = th + ksz - 1 if stride == 1 else ksz * th
        xb = 2 * r_rows * W_out8 * max(_round_up(K, 128), 128) * c_bytes  # lane-padded
        wb = 2 * ksz * _round_up(K, 8) * Cpad * c_bytes
        yb = 2 * th * W_out8 * Cpad * 4
        ab = Lt * Cpad * 4
        return xb + wb + yb + ab

    if tile_rows is not None:
        tile_h = max(1, min(int(tile_rows), H_out))
    else:
        tile_h = H_out
        while tile_h > 1 and est_bytes(tile_h) > vmem_budget_bytes:
            tile_h = (tile_h + 1) // 2
    T = _cdiv(H_out, tile_h)
    tile_h = _cdiv(H_out, T)                              # rebalance the tail
    H_out_pad = T * tile_h
    L = tile_h * W_out8
    R_rows = tile_h + ksz - 1 if stride == 1 else ksz * tile_h
    R_flat = R_rows * W_out8
    step = W_out8 if stride == 1 else L
    vmem_limit = int(min(max(2 * est_bytes(tile_h), 32 * 2**20), 64 * 2**20))

    # ---- single gather: NCHW->NHWC + bf16 cast + 2x nearest upsample +
    # ---- reflection pad + kw-unfold (+ col stride) + row tiling (+ row stride) -
    x_nhwc = jnp.transpose(x_nchw, (0, 2, 3, 1)).astype(compute_dtype)

    t0 = jnp.arange(T) * tile_h
    if stride == 1:
        prow = t0[:, None] + jnp.arange(R_rows)[None, :]                  # (T, R_rows)
    else:
        ho = jnp.arange(tile_h)
        ki = jnp.arange(ksz)
        prow = (t0[:, None, None] + ho[None, None, :]) * stride + ki[None, :, None]
        prow = prow.reshape(T, R_rows)                                    # (T, ksz*tile_h)
    prow = jnp.clip(prow, 0, Hp - 1)        # tail rows: any valid index (masked later)
    srow = _reflect_index(prow, pad, H2)
    if upsample:
        srow = srow // 2

    pcol = jnp.arange(W_out)[:, None] * stride + jnp.arange(ksz)[None, :]  # (W_out, ksz)
    scol = _reflect_index(pcol, pad, W2)
    if upsample:
        scol = scol // 2

    xg = x_nhwc[:, srow[:, :, None, None], scol[None, None, :, :], :]
    # (N, T, R_rows, W_out, ksz, C_in); zero-pad columns to a sublane multiple.
    xg = jnp.pad(xg, ((0, 0), (0, 0), (0, 0), (0, W_out8 - W_out), (0, 0), (0, 0)))
    x_tiles = xg.reshape(N, T, R_flat, K)

    # ---- weights / params: (Cout, Cin, kh, kw) -> (kh, kw*Cin, Cpad) -----------
    w = jnp.transpose(weight.astype(jnp.float32), (2, 3, 1, 0))           # (kh,kw,Cin,Cout)
    w = jnp.pad(w, ((0, 0), (0, 0), (0, 0), (0, Cpad - C_out)))
    w = w.reshape(ksz, K, Cpad).astype(compute_dtype)
    b = jnp.pad(bias.astype(jnp.float32), (0, Cpad - C_out)).reshape(1, Cpad)
    g = jnp.ones((C_out,), jnp.float32) if gamma is None else gamma.astype(jnp.float32)
    be = jnp.zeros((C_out,), jnp.float32) if beta is None else beta.astype(jnp.float32)
    g = jnp.pad(g, (0, Cpad - C_out)).reshape(1, Cpad)
    be = jnp.pad(be, (0, Cpad - C_out)).reshape(1, Cpad)

    add_bias = not normalize      # bias cancels exactly under InstanceNorm
    cparams = pltpu.CompilerParams(
        dimension_semantics=("parallel", "parallel"),
        vmem_limit_bytes=vmem_limit)
    # TODO(synk): on v7x, single-buffer the constant weight block
    # (pipeline_mode=pl.Buffered(1)) and check both TensorCores are used
    # (CORE_PARALLEL) once verified on hardware.

    x_spec = pl.BlockSpec((1, 1, R_flat, K), lambda n, t: (n, t, 0, 0))
    w_spec = pl.BlockSpec((ksz, K, Cpad), lambda n, t: (0, 0, 0))
    v_spec = pl.BlockSpec((1, Cpad), lambda n, t: (0, 0))
    y_spec = pl.BlockSpec((1, tile_h, W_out8, Cpad), lambda n, t: (n, t, 0, 0))

    if T == 1:
        # Whole sample fits one row tile: fuse conv + InstanceNorm + ReLU.
        fused = functools.partial(
            _conv_fused_kernel, ksz=ksz, step=step, tile_h=tile_h, w8=W_out8,
            cpad=Cpad, add_bias=add_bias, normalize=normalize, relu=relu,
            inv_p=1.0 / float(H_out * W_out), eps=float(eps))
        out_nhwc = pl.pallas_call(
            fused,
            out_shape=jax.ShapeDtypeStruct((N, H_out_pad, W_out8, Cpad), jnp.float32),
            grid=(N, T),
            in_specs=[x_spec, w_spec, v_spec, v_spec, v_spec],
            out_specs=y_spec,
            scratch_shapes=[pltpu.VMEM((L, Cpad), jnp.float32)],
            compiler_params=cparams,
        )(x_tiles, w, b, g, be)
    else:
        conv = functools.partial(
            _conv_stats_kernel, ksz=ksz, step=step, tile_h=tile_h, w8=W_out8,
            cpad=Cpad, add_bias=add_bias, need_stats=normalize, h_out=H_out)
        y, stats = pl.pallas_call(
            conv,
            out_shape=(jax.ShapeDtypeStruct((N, H_out_pad, W_out8, Cpad), compute_dtype),
                       jax.ShapeDtypeStruct((N, T, 2, Cpad), jnp.float32)),
            grid=(N, T),
            in_specs=[x_spec, w_spec, v_spec],
            out_specs=(y_spec,
                       pl.BlockSpec((1, 1, 2, Cpad), lambda n, t: (n, t, 0, 0))),
            scratch_shapes=[pltpu.VMEM((L, Cpad), jnp.float32)],
            compiler_params=cparams,
        )(x_tiles, w, b)

        if normalize or relu:
            if normalize:
                P = float(H_out * W_out)
                s = jnp.sum(stats, axis=1)                       # (N, 2, Cpad)
                mean = s[:, 0] / P
                var = jnp.maximum(s[:, 1] / P - mean * mean, 0.0)
                inv = jax.lax.rsqrt(var + eps)
                scale = g * inv                                  # (N, Cpad)
                shift = be - mean * scale
            else:
                scale = jnp.ones((N, Cpad), jnp.float32)
                shift = jnp.zeros((N, Cpad), jnp.float32)
            out_nhwc = pl.pallas_call(
                functools.partial(_affine_relu_kernel, relu=relu),
                out_shape=jax.ShapeDtypeStruct((N, H_out_pad, W_out8, Cpad),
                                               compute_dtype),
                grid=(N, T),
                in_specs=[y_spec,
                          pl.BlockSpec((1, 1, Cpad), lambda n, t: (n, 0, 0)),
                          pl.BlockSpec((1, 1, Cpad), lambda n, t: (n, 0, 0))],
                out_specs=y_spec,
                input_output_aliases={0: 0},                     # affine+ReLU in place
                compiler_params=cparams,
            )(y, scale.reshape(N, 1, Cpad), shift.reshape(N, 1, Cpad))
        else:
            out_nhwc = y

    out_nhwc = out_nhwc[:, :H_out, :W_out, :C_out].astype(jnp.float32)
    # TODO(synk): keep activations NHWC / Cpad-padded across a full network to
    # drop this per-layer slice + NHWC->NCHW transpose.
    return jnp.transpose(out_nhwc, (0, 3, 1, 2))


# --------------------------------------------------------------------------- #
# Pure-JAX f32 reference (PyTorch semantics).
# --------------------------------------------------------------------------- #
def _reference_forward(x, weight, bias, gamma, beta, *, kernel_size, stride,
                       upsample, normalize, relu, eps=1e-5):
    x = x.astype(jnp.float32)
    if upsample:
        x = jnp.repeat(jnp.repeat(x, 2, axis=2), 2, axis=3)
    pad = kernel_size // 2
    xp = jnp.pad(x, ((0, 0), (0, 0), (pad, pad), (pad, pad)), mode="reflect")
    y = jax.lax.conv_general_dilated(
        xp, weight.astype(jnp.float32),
        window_strides=(stride, stride), padding="VALID",
        dimension_numbers=("NCHW", "OIHW", "NCHW"))
    y = y + bias.reshape(1, -1, 1, 1)
    if normalize:
        mean = jnp.mean(y, axis=(2, 3), keepdims=True)
        var = jnp.mean((y - mean) ** 2, axis=(2, 3), keepdims=True)
        y = (y - mean) * jax.lax.rsqrt(var + eps)
        y = y * gamma.reshape(1, -1, 1, 1) + beta.reshape(1, -1, 1, 1)
    if relu:
        y = jnp.maximum(y, 0.0)
    return y


if __name__ == "__main__":
    key = jax.random.PRNGKey(0)
    kx, kw_, kb, kg, kbe = jax.random.split(key, 5)

    N, C_in, H, W = 2, 4, 16, 16
    C_out, ksz = 8, 3

    x = jax.random.normal(kx, (N, C_in, H, W), dtype=jnp.float32)
    weight = jax.random.normal(kw_, (C_out, C_in, ksz, ksz), dtype=jnp.float32) * 0.1
    bias = jax.random.normal(kb, (C_out,), dtype=jnp.float32) * 0.1
    gamma = 1.0 + 0.1 * jax.random.normal(kg, (C_out,), dtype=jnp.float32)
    beta = 0.1 * jax.random.normal(kbe, (C_out,), dtype=jnp.float32)

    def run_check(name, tol, *, stride=1, upsample=False, normalize=True,
                  relu=True, compute_dtype=jnp.float32, tile_rows=None):
        ref = _reference_forward(x, weight, bias, gamma, beta,
                                 kernel_size=ksz, stride=stride, upsample=upsample,
                                 normalize=normalize, relu=relu)
        out = conv_block_forward(x, weight, bias, gamma, beta,
                                 kernel_size=ksz, stride=stride, upsample=upsample,
                                 normalize=normalize, relu=relu,
                                 compute_dtype=compute_dtype, tile_rows=tile_rows)
        out = jax.block_until_ready(out)
        assert out.shape == ref.shape, (name, out.shape, ref.shape)
        err = float(jnp.max(jnp.abs(out - ref)))
        assert err < tol, (name, err)

    # Fused single-tile path (conv + InstanceNorm + ReLU in one kernel), f32.
    run_check("fused_f32", 1e-3)
    # Two-pass path with a ragged tail tile (tile_h=6 over H_out=16), in-place pass 2.
    run_check("twopass_tail_f32", 1e-3, tile_rows=6)
    # Default bf16 MXU path.
    run_check("fused_bf16", 5e-2, compute_dtype=jnp.bfloat16)
    # Strided (downsampling) conv: row/column stride folded into the gather.
    run_check("stride2_f32", 1e-3, stride=2)
    # 2x nearest-neighbour upsample folded into the gather (no materialized repeat).
    run_check("upsample_f32", 1e-3, upsample=True)
    # Plain conv + bias (no norm / relu), forced multi-tile, pass 2 skipped.
    run_check("plain_f32", 1e-3, normalize=False, relu=False, tile_rows=8)

    print("KERNEL_OK")
</pallas_src>

<mosaic_0001>
module attributes {stable_mosaic.version = 11 : i64} {
  func.func @_conv_fused_kernel(%arg0: i32, %arg1: i32, %arg2: memref<1x1x288x12xf32, #tpu.memory_space<vmem>>, %arg3: memref<3x12x128xf32, #tpu.memory_space<vmem>>, %arg4: memref<1x128xf32, #tpu.memory_space<vmem>>, %arg5: memref<1x128xf32, #tpu.memory_space<vmem>>, %arg6: memref<1x128xf32, #tpu.memory_space<vmem>>, %arg7: memref<1x16x16x128xf32, #tpu.memory_space<vmem>>, %arg8: memref<256x128xf32, #tpu.memory_space<vmem>>) attributes {dimension_semantics = [#tpu.dimension_semantics<parallel>, #tpu.dimension_semantics<parallel>], iteration_bounds = array<i64: 2, 1>, scalar_prefetch = 0 : i64, scratch_operands = 1 : i64, tpu.core_type = #tpu.core_type<tc>, window_params = [{transform_indices = @transform_0, window_bounds = array<i64: 1, 1, 288, 12>}, {pipeline_mode = #tpu.pipeline_mode<synchronous>, transform_indices = @transform_1, window_bounds = array<i64: 3, 12, 128>}, {pipeline_mode = #tpu.pipeline_mode<synchronous>, transform_indices = @transform_2, window_bounds = array<i64: 1, 128>}, {pipeline_mode = #tpu.pipeline_mode<synchronous>, transform_indices = @transform_3, window_bounds = array<i64: 1, 128>}, {pipeline_mode = #tpu.pipeline_mode<synchronous>, transform_indices = @transform_4, window_bounds = array<i64: 1, 128>}, {transform_indices = @transform_5, window_bounds = array<i64: 1, 16, 16, 128>}]} {
    %c0 = arith.constant 0 : index
    %c0_0 = arith.constant 0 : index
    %c0_1 = arith.constant 0 : index
    %c0_2 = arith.constant 0 : index
    %0 = vector.load %arg2[%c0, %c0_0, %c0_1, %c0_2] : memref<1x1x288x12xf32, #tpu.memory_space<vmem>>, vector<1x1x256x12xf32>
    %1 = vector.shape_cast %0 : vector<1x1x256x12xf32> to vector<256x12xf32>
    %c0_3 = arith.constant 0 : index
    %c0_4 = arith.constant 0 : index
    %c0_5 = arith.constant 0 : index
    %2 = vector.load %arg3[%c0_3, %c0_4, %c0_5] : memref<3x12x128xf32, #tpu.memory_space<vmem>>, vector<1x12x128xf32>
    %3 = vector.shape_cast %2 : vector<1x12x128xf32> to vector<12x128xf32>
    %cst = arith.constant dense<0.000000e+00> : vector<256x128xf32>
    %4 = tpu.matmul %1, %3, %cst {dimension_numbers = #tpu.dot_dimension_numbers<[1], [0], [0], [1], [0, 0, 1, 1], [], []>} : vector<256x12xf32>, vector<12x128xf32>, vector<256x128xf32> -> vector<256x128xf32>
    %c0_6 = arith.constant 0 : index
    %c0_7 = arith.constant 0 : index
    %5 = vector.load %arg8[%c0_6, %c0_7] : memref<256x128xf32, #tpu.memory_space<vmem>>, vector<256x128xf32>
    tpu.vector_store %arg8[%c0_6, %c0_7], %4 {strides = array<i32>} : memref<256x128xf32, #tpu.memory_space<vmem>>, vector<256x128xf32>,
    %c0_8 = arith.constant 0 : index
    %c0_9 = arith.constant 0 : index
    %c16 = arith.constant 16 : index
    %c0_10 = arith.constant 0 : index
    %6 = vector.load %arg2[%c0_8, %c0_9, %c16, %c0_10] : memref<1x1x288x12xf32, #tpu.memory_space<vmem>>, vector<1x1x256x12xf32>
    %7 = vector.shape_cast %6 : vector<1x1x256x12xf32> to vector<256x12xf32>
    %c1 = arith.constant 1 : index
    %c0_11 = arith.constant 0 : index
    %c0_12 = arith.constant 0 : index
    %8 = vector.load %arg3[%c1, %c0_11, %c0_12] : memref<3x12x128xf32, #tpu.memory_space<vmem>>, vector<1x12x128xf32>
    %9 = vector.shape_cast %8 : vector<1x12x128xf32> to vector<12x128xf32>
    %cst_13 = arith.constant dense<0.000000e+00> : vector<256x128xf32>
    %10 = tpu.matmul %7, %9, %cst_13 {dimension_numbers = #tpu.dot_dimension_numbers<[1], [0], [0], [1], [0, 0, 1, 1], [], []>} : vector<256x12xf32>, vector<12x128xf32>, vector<256x128xf32> -> vector<256x128xf32>
    %c0_14 = arith.constant 0 : index
    %c0_15 = arith.constant 0 : index
    %11 = vector.load %arg8[%c0_14, %c0_15] : memref<256x128xf32, #tpu.memory_space<vmem>>, vector<256x128xf32>
    %12 = arith.addf %11, %10 : vector<256x128xf32>
    %c0_16 = arith.constant 0 : index
    %c0_17 = arith.constant 0 : index
    %13 = vector.load %arg8[%c0_16, %c0_17] : memref<256x128xf32, #tpu.memory_space<vmem>>, vector<256x128xf32>
    tpu.vector_store %arg8[%c0_16, %c0_17], %12 {strides = array<i32>} : memref<256x128xf32, #tpu.memory_space<vmem>>, vector<256x128xf32>,
    %c0_18 = arith.constant 0 : index
    %c0_19 = arith.constant 0 : index
    %c32 = arith.constant 32 : index
    %c0_20 = arith.constant 0 : index
    %14 = vector.load %arg2[%c0_18, %c0_19, %c32, %c0_20] : memref<1x1x288x12xf32, #tpu.memory_space<vmem>>, vector<1x1x256x12xf32>
    %15 = vector.shape_cast %14 : vector<1x1x256x12xf32> to vector<256x12xf32>
    %c2 = arith.constant 2 : index
    %c0_21 = arith.constant 0 : index
    %c0_22 = arith.constant 0 : index
    %16 = vector.load %arg3[%c2, %c0_21, %c0_22] : memref<3x12x128xf32, #tpu.memory_space<vmem>>, vector<1x12x128xf32>
    %17 = vector.shape_cast %16 : vector<1x12x128xf32> to vector<12x128xf32>
    %cst_23 = arith.constant dense<0.000000e+00> : vector<256x128xf32>
    %18 = tpu.matmul %15, %17, %cst_23 {dimension_numbers = #tpu.dot_dimension_numbers<[1], [0], [0], [1], [0, 0, 1, 1], [], []>} : vector<256x12xf32>, vector<12x128xf32>, vector<256x128xf32> -> vector<256x128xf32>
    %c0_24 = arith.constant 0 : index
    %c0_25 = arith.constant 0 : index
    %19 = vector.load %arg8[%c0_24, %c0_25] : memref<256x128xf32, #tpu.memory_space<vmem>>, vector<256x128xf32>
    %20 = arith.addf %19, %18 : vector<256x128xf32>
    %c0_26 = arith.constant 0 : index
    %c0_27 = arith.constant 0 : index
    %21 = vector.load %arg8[%c0_26, %c0_27] : memref<256x128xf32, #tpu.memory_space<vmem>>, vector<256x128xf32>
    tpu.vector_store %arg8[%c0_26, %c0_27], %20 {strides = array<i32>} : memref<256x128xf32, #tpu.memory_space<vmem>>, vector<256x128xf32>,
    %c0_28 = arith.constant 0 : index
    %c0_29 = arith.constant 0 : index
    %22 = vector.load %arg8[%c0_28, %c0_29] : memref<256x128xf32, #tpu.memory_space<vmem>>, vector<256x128xf32>
    %cst_30 = arith.constant dense<0.000000e+00> : vector<128xf32>
    %23 = vector.multi_reduction <add>, %22, %cst_30 [0] : vector<256x128xf32> to vector<128xf32>
    %24 = vector.shape_cast %23 : vector<128xf32> to vector<1x128xf32>
    %cst_31 = arith.constant 3.906250e-03 : f32
    %25 = vector.broadcast %cst_31 : f32 to vector<1x128xf32>
    %26 = arith.mulf %24, %25 : vector<1x128xf32>
    %27 = arith.mulf %22, %22 : vector<256x128xf32>
    %cst_32 = arith.constant dense<0.000000e+00> : vector<128xf32>
    %28 = vector.multi_reduction <add>, %27, %cst_32 [0] : vector<256x128xf32> to vector<128xf32>
    %29 = vector.shape_cast %28 : vector<128xf32> to vector<1x128xf32>
    %cst_33 = arith.constant 3.906250e-03 : f32
    %30 = vector.broadcast %cst_33 : f32 to vector<1x128xf32>
    %31 = arith.mulf %29, %30 : vector<1x128xf32>
    %32 = arith.mulf %26, %26 : vector<1x128xf32>
    %33 = arith.subf %31, %32 : vector<1x128xf32>
    %cst_34 = arith.constant 0.000000e+00 : f32
    %34 = vector.broadcast %cst_34 : f32 to vector<1x128xf32>
    %35 = arith.maximumf %33, %34 : vector<1x128xf32>
    %cst_35 = arith.constant 9.99999974E-6 : f32
    %36 = vector.broadcast %cst_35 : f32 to vector<1x128xf32>
    %37 = arith.addf %35, %36 : vector<1x128xf32>
    %38 = math.rsqrt %37 : vector<1x128xf32>
    %c0_36 = arith.constant 0 : index
    %c0_37 = arith.constant 0 : index
    %39 = vector.load %arg5[%c0_36, %c0_37] : memref<1x128xf32, #tpu.memory_space<vmem>>, vector<1x128xf32>
    %40 = arith.mulf %39, %38 : vector<1x128xf32>
    %c0_38 = arith.constant 0 : index
    %c0_39 = arith.constant 0 : index
    %41 = vector.load %arg6[%c0_38, %c0_39] : memref<1x128xf32, #tpu.memory_space<vmem>>, vector<1x128xf32>
    %42 = arith.mulf %26, %40 : vector<1x128xf32>
    %43 = arith.subf %41, %42 : vector<1x128xf32>
    %44 = vector.broadcast %40 : vector<1x128xf32> to vector<256x128xf32>
    %45 = arith.mulf %22, %44 : vector<256x128xf32>
    %46 = vector.broadcast %43 : vector<1x128xf32> to vector<256x128xf32>
    %47 = arith.addf %45, %46 : vector<256x128xf32>
    %cst_40 = arith.constant 0.000000e+00 : f32
    %48 = vector.broadcast %cst_40 : f32 to vector<256x128xf32>
    %49 = arith.maximumf %47, %48 : vector<256x128xf32>
    %50 = vector.shape_cast %49 : vector<256x128xf32> to vector<16x16x128xf32>
    %c0_41 = arith.constant 0 : index
    %c0_42 = arith.constant 0 : index
    %c0_43 = arith.constant 0 : index
    %c0_44 = arith.constant 0 : index
    %51 = vector.load %arg7[%c0_41, %c0_42, %c0_43, %c0_44] : memref<1x16x16x128xf32, #tpu.memory_space<vmem>>, vector<1x16x16x128xf32>
    %52 = vector.shape_cast %51 : vector<1x16x16x128xf32> to vector<16x16x128xf32>
    %53 = vector.shape_cast %50 : vector<16x16x128xf32> to vector<1x16x16x128xf32>
    tpu.vector_store %arg7[%c0_41, %c0_42, %c0_43, %c0_44], %53 {strides = array<i32>} : memref<1x16x16x128xf32, #tpu.memory_space<vmem>>, vector<1x16x16x128xf32>,
    return
  }
  func.func @transform_0(%arg0: i32, %arg1: i32) -> (i32, i32, i32, i32) {
    %c0_i32 = arith.constant 0 : i32
    %c0_i32_0 = arith.constant 0 : i32
    %c0_i32_1 = arith.constant 0 : i32
    return %arg0, %arg1, %c0_i32, %c0_i32_0 : i32, i32, i32, i32
  }
  func.func @transform_1(%arg0: i32, %arg1: i32) -> (i32, i32, i32) {
    %c0_i32 = arith.constant 0 : i32
    %c0_i32_0 = arith.constant 0 : i32
    %c0_i32_1 = arith.constant 0 : i32
    %c0_i32_2 = arith.constant 0 : i32
    return %c0_i32, %c0_i32_0, %c0_i32_1 : i32, i32, i32
  }
  func.func @transform_2(%arg0: i32, %arg1: i32) -> (i32, i32) {
    %c0_i32 = arith.constant 0 : i32
    %c0_i32_0 = arith.constant 0 : i32
    %c0_i32_1 = arith.constant 0 : i32
    return %c0_i32, %c0_i32_0 : i32, i32
  }
  func.func @transform_3(%arg0: i32, %arg1: i32) -> (i32, i32) {
    %c0_i32 = arith.constant 0 : i32
    %c0_i32_0 = arith.constant 0 : i32
    %c0_i32_1 = arith.constant 0 : i32
    return %c0_i32, %c0_i32_0 : i32, i32
  }
  func.func @transform_4(%arg0: i32, %arg1: i32) -> (i32, i32) {
    %c0_i32 = arith.constant 0 : i32
    %c0_i32_0 = arith.constant 0 : i32
    %c0_i32_1 = arith.constant 0 : i32
    return %c0_i32, %c0_i32_0 : i32, i32
  }
  func.func @transform_5(%arg0: i32, %arg1: i32) -> (i32, i32, i32, i32) {
    %c0_i32 = arith.constant 0 : i32
    %c0_i32_0 = arith.constant 0 : i32
    %c0_i32_1 = arith.constant 0 : i32
    return %arg0, %arg1, %c0_i32, %c0_i32_0 : i32, i32, i32, i32
  }
}

</mosaic_0001>

<bundles_post_ra>
// kernel: conv_block_forward.1
= control target key start
LH: loop header
LB: loop body
LE: loop exit
PB: predicated region body
PF: predicated region fallthrough
CT: control target
= control target key end

     0   :  { %s2409_s18 = smov 0   ;;  %s2411_s19 = smov 0   ;;  %s3030_s0 = inlined_call_operand.vmem [shape: f32[2,1,288,12], index: 0, kind: input, shape index: {}]   ;;  %s3031_s1 = inlined_call_operand.vmem [shape: f32[3,12,128], index: 1, kind: input, shape index: {}]   ;;  %s3032_s2 = inlined_call_operand.vmem [shape: f32[1,128], index: 2, kind: input, shape index: {}]   ;;  %s3033_s3 = inlined_call_operand.vmem [shape: f32[1,128], index: 3, kind: input, shape index: {}]   ;;  %s3034_s4 = inlined_call_operand.vmem [shape: f32[1,128], index: 4, kind: input, shape index: {}]   ;;  %s3035_s5 = inlined_call_operand.vmem [shape: f32[2,16,16,128], index: 5, kind: output, shape index: {}]  }
   0x1   :  { %s2413_s20 = smov 0  }
   0x2 LB: > { %s27_s2 = sadd.s32 1, %s2373_s19  ;;  %p1956_p0 = scmp.ge.s32.totalorder %s2377_s20, 1  ;;  %s2377_s20 = sphi %s2413_s20, %s15_s20   ;;  %s2373_s19 = sphi %s2411_s19, %s3037_s19   ;;  %s2369_s18 = sphi %s2409_s18, %s3036_s18  }
   0x3   : > { %p29_p1 = scmp.ge.s32.totalorder %s27_s2, 2  ;;  %p207_p2 = scmp.lt.s32.totalorder %s2377_s20, 3 }
   0x5   : > { %s3039_s2 = smov (%p29_p1, %s27_s2), 0  ;;  %p208_p3 = pnand %p1956_p0, %p207_p2 }
   0x6   : > { %p244_p4 = scmp.lt.s32.totalorder (!%p208_p3), %s2369_s18, 1 }
   0x7   : > { %211 = sbr.rel (%p208_p3) target bundleno = 389 (0x185), region = 40 }
   0xc   : > { %v297_v0 = vld [vmem:[%s3031_s1 + $0x8] sm:$0xf]  ;;  %vm395_vm0 = vcmask 1043456   ;;  %v296_v1 = vld [vmem:[%s3031_s1] sm:$0xff]  ;;  %s3041_s18 = smov (!%p244_p4, %s2369_s18), 1  ;;  %vm298_vm1 = vcmask 97280  }
   0xd   : > { %2324 = vmatprep.subr.msk.mxu1 %vm395_vm0, %v297_v0  ;;  %2168 = vmatprep.subr.msk.mxu0 %vm395_vm0, %v297_v0  ;;  %v1994_v2 = vld [vmem:[%s3031_s1 + $0x18] sm:$0xf]  ;;  %v2029_v3 = vld [vmem:[%s3031_s1 + $0x28] sm:$0xf]  ;;  %s2328_s29 = smul.u32 288, %s3041_s18  ;;  %v1993_v10 = vld [vmem:[%s3031_s1 + $0x10] sm:$0xff] }
   0xe   : > { %2326 = vmatpush3.msk.msra.mxu1 %vm395_vm0, %v297_v0  ;;  %2169 = vmatpush3.msk.msra.mxu0 %vm395_vm0, %v297_v0  ;;  %v2028_v11 = vld [vmem:[%s3031_s1 + $0x20] sm:$0xff]  ;;  %s2065_s16 = sshll.u32 %s3041_s18, 8 }
   0xf   : > { %2325 = vmatprep.subr.mxu1 %v296_v1  ;;  %2170 = vmatprep.subr.mxu0 %v296_v1  ;;  %s2451_s7 = scalar_lea.vmem %s3030_s0, %s2328_s29  ;;  %s2967_s21 = scalar_lea.vmem %s3035_s5, %s2065_s16 }
  0x10   : > { %2327 = vmatpush3.msra.mxu1 %v296_v1  ;;  %2171 = vmatpush3.msra.mxu0 %v296_v1  ;;  %v264_v4 = vld [vmem:[%s2451_s7] sm:$0xff]  ;;  %v265_v6 = vld [vmem:[%s2451_s7 + $0x8] sm:$0xff]  ;;  %v2465_v8 = vld [vmem:[%s2451_s7 + $0x10] sm:$0xff] }
  0x11   : > { %2220 = vmatprep.subr.msk.mxu1 %vm395_vm0, %v1994_v2  ;;  %2272 = vmatprep.subr.msk.mxu0 %vm395_vm0, %v2029_v3  ;;  %v2455_v5 = vld [vmem:[%s2451_s7 + $0x80] sm:$0xff]  ;;  %v2462_v7 = vld [vmem:[%s2451_s7 + $0x88] sm:$0xff]  ;;  %v2468_v9 = vld [vmem:[%s2451_s7 + $0x90] sm:$0xff] }
  0x12   : > { %2172 = vmatprep.mubr.msk.f32.mxu0 %vm298_vm1, %v264_v4  ;;  %2196 = vmatprep.mubr.msk.f32.mxu1 %vm298_vm1, %v2455_v5  ;;  %v267_v12 = vld [vmem:[%s2451_s7 + $0x18] sm:$0xff]  ;;  %v268_v14 = vld [vmem:[%s2451_s7 + $0x20] sm:$0xff]  ;;  %v269_v16 = vld [vmem:[%s2451_s7 + $0x28] sm:$0xff] }
  0x13   : > { %2173 = vmatmul.mubr.msk.f32.vlgmr.msra.gmra.mxu0 %vm298_vm1, %v265_v6  ;;  %2197 = vmatmul.mubr.msk.f32.vlgmr.msra.gmra.mxu1 %vm298_vm1, %v2462_v7  ;;  %v2483_v13 = vld [vmem:[%s2451_s7 + $0x98] sm:$0xff]  ;;  %v2491_v15 = vld [vmem:[%s2451_s7 + $0xa0] sm:$0xff]  ;;  %v2501_v17 = vld [vmem:[%s2451_s7 + $0xa8] sm:$0xff] }
  0x14   : > { %2221 = vmatpush3.msk.msra.mxu1 %vm395_vm0, %v1994_v2  ;;  %2273 = vmatpush3.msk.msra.mxu0 %vm395_vm0, %v2029_v3  ;;  %v270_v18 = vld [vmem:[%s2451_s7 + $0x30] sm:$0xff]  ;;  %v271_v20 = vld [vmem:[%s2451_s7 + $0x38] sm:$0xff]  ;;  %v272_v22 = vld [vmem:[%s2451_s7 + $0x40] sm:$0xff] }
  0x15   : > { %2175 = vmatprep.mubr.msk.f32.mxu0 %vm298_vm1, %v2465_v8  ;;  %2199 = vmatprep.mubr.msk.f32.mxu1 %vm298_vm1, %v2468_v9  ;;  %v2505_v19 = vld [vmem:[%s2451_s7 + $0xb0] sm:$0xff]  ;;  %v2515_v21 = vld [vmem:[%s2451_s7 + $0xb8] sm:$0xff]  ;;  %v2519_v23 = vld [vmem:[%s2451_s7 + $0xc0] sm:$0xff] }
  0x16   : > { %2222 = vmatprep.subr.mxu1 %v1993_v10  ;;  %2274 = vmatprep.subr.mxu0 %v2028_v11  ;;  %v273_v24 = vld [vmem:[%s2451_s7 + $0x48] sm:$0xff]  ;;  %v274_v26 = vld [vmem:[%s2451_s7 + $0x50] sm:$0xff]  ;;  %v275_v28 = vld [vmem:[%s2451_s7 + $0x58] sm:$0xff] }
  0x17   : > { %2176 = vmatmul.mubr.msk.f32.gmra.mxu0 %vm298_vm1, %v267_v12  ;;  %2200 = vmatmul.mubr.msk.f32.gmra.mxu1 %vm298_vm1, %v2483_v13  ;;  %v2529_v25 = vld [vmem:[%s2451_s7 + $0xc8] sm:$0xff]  ;;  %v2533_v27 = vld [vmem:[%s2451_s7 + $0xd0] sm:$0xff]  ;;  %v2543_v29 = vld [vmem:[%s2451_s7 + $0xd8] sm:$0xff] }
  0x18   : > { %2178 = vmatprep.mubr.msk.f32.mxu0 %vm298_vm1, %v268_v14  ;;  %2202 = vmatprep.mubr.msk.f32.mxu1 %vm298_vm1, %v2491_v15  ;;  %v276_v30 = vld [vmem:[%s2451_s7 + $0x60] sm:$0xff]  ;;  %v277_v32 = vld [vmem:[%s2451_s7 + $0x68] sm:$0xff]  ;;  %v278_v34 = vld [vmem:[%s2451_s7 + $0x70] sm:$0xff] }
  0x19   : > { %2223 = vmatpush3.msra.mxu1 %v1993_v10  ;;  %2275 = vmatpush3.msra.mxu0 %v2028_v11  ;;  %v2547_v31 = vld [vmem:[%s2451_s7 + $0xe0] sm:$0xff]  ;;  %v2557_v33 = vld [vmem:[%s2451_s7 + $0xe8] sm:$0xff]  ;;  %v2561_v35 = vld [vmem:[%s2451_s7 + $0xf0] sm:$0xff] }
  0x1a   : > { %v279_v36 = vld [vmem:[%s2451_s7 + $0x78] sm:$0xff]  ;;  %v1139_v38 = vld [vmem:[%s2451_s7 + $0x100] sm:$0xff]  ;;  %v1140_v39 = vld [vmem:[%s2451_s7 + $0x108] sm:$0xff] }
  0x1b   : > { %2179 = vmatmul.mubr.msk.f32.gmra.mxu0 %vm298_vm1, %v269_v16  ;;  %2203 = vmatmul.mubr.msk.f32.gmra.mxu1 %vm298_vm1, %v2501_v17  ;;  %v2571_v37 = vld [vmem:[%s2451_s7 + $0xf8] sm:$0xff]  ;;  %v1141_v40 = vld [vmem:[%s2451_s7 + $0x110] sm:$0xff] }
  0x1c   : > { %2181 = vmatprep.mubr.msk.f32.mxu0 %vm298_vm1, %v270_v18  ;;  %2205 = vmatprep.mubr.msk.f32.mxu1 %vm298_vm1, %v2505_v19  ;;  %v1142_v41 = vld [vmem:[%s2451_s7 + $0x118] sm:$0xff] }
  0x1f   : > { %2182 = vmatmul.mubr.msk.f32.gmra.mxu0 %vm298_vm1, %v271_v20  ;;  %2206 = vmatmul.mubr.msk.f32.gmra.mxu1 %vm298_vm1, %v2515_v21 }
  0x20   : > { %2184 = vmatprep.mubr.msk.f32.mxu0 %vm298_vm1, %v272_v22  ;;  %2208 = vmatprep.mubr.msk.f32.mxu1 %vm298_vm1, %v2519_v23 }
  0x23   : > { %2185 = vmatmul.mubr.msk.f32.gmra.mxu0 %vm298_vm1, %v273_v24  ;;  %2209 = vmatmul.mubr.msk.f32.gmra.mxu1 %vm298_vm1, %v2529_v25 }
  0x24   : > { %2187 = vmatprep.mubr.msk.f32.mxu0 %vm298_vm1, %v274_v26  ;;  %2211 = vmatprep.mubr.msk.f32.mxu1 %vm298_vm1, %v2533_v27 }
  0x27   : > { %2188 = vmatmul.mubr.msk.f32.gmra.mxu0 %vm298_vm1, %v275_v28  ;;  %2212 = vmatmul.mubr.msk.f32.gmra.mxu1 %vm298_vm1, %v2543_v29 }
  0x28   : > { %2190 = vmatprep.mubr.msk.f32.mxu0 %vm298_vm1, %v276_v30  ;;  %2214 = vmatprep.mubr.msk.f32.mxu1 %vm298_vm1, %v2547_v31 }
  0x2b   : > { %2191 = vmatmul.mubr.msk.f32.gmra.mxu0 %vm298_vm1, %v277_v32  ;;  %2215 = vmatmul.mubr.msk.f32.gmra.mxu1 %vm298_vm1, %v2557_v33 }
  0x2c   : > { %2193 = vmatprep.mubr.msk.f32.mxu0 %vm298_vm1, %v278_v34  ;;  %2217 = vmatprep.mubr.msk.f32.mxu1 %vm298_vm1, %v2561_v35 }
  0x2f   : > { %2194 = vmatmul.mubr.msk.f32.gmra.mxu0 %vm298_vm1, %v279_v36  ;;  %2218 = vmatmul.mubr.msk.f32.gmra.mxu1 %vm298_vm1, %v2571_v37 }
  0x30   : > { %2224 = vmatprep.mubr.msk.f32.mxu1 %vm298_vm1, %v2465_v8  ;;  %2276 = vmatprep.mubr.msk.f32.mxu0 %vm298_vm1, %v268_v14 }
  0x33   : > { %2225 = vmatmul.mubr.msk.f32.vlgmr.msra.gmra.mxu1 %vm298_vm1, %v267_v12  ;;  %2277 = vmatmul.mubr.msk.f32.vlgmr.msra.gmra.mxu0 %vm298_vm1, %v269_v16 }
  0x34   : > { %2227 = vmatprep.mubr.msk.f32.mxu1 %vm298_vm1, %v268_v14  ;;  %2279 = vmatprep.mubr.msk.f32.mxu0 %vm298_vm1, %v270_v18 }
  0x37   : > { %2228 = vmatmul.mubr.msk.f32.gmra.mxu1 %vm298_vm1, %v269_v16  ;;  %2280 = vmatmul.mubr.msk.f32.gmra.mxu0 %vm298_vm1, %v271_v20 }
  0x38   : > { %2230 = vmatprep.mubr.msk.f32.mxu1 %vm298_vm1, %v270_v18  ;;  %2282 = vmatprep.mubr.msk.f32.mxu0 %vm298_vm1, %v272_v22 }
  0x3b   : > { %2231 = vmatmul.mubr.msk.f32.gmra.mxu1 %vm298_vm1, %v271_v20  ;;  %2283 = vmatmul.mubr.msk.f32.gmra.mxu0 %vm298_vm1, %v273_v24 }
  0x3c   : > { %2233 = vmatprep.mubr.msk.f32.mxu1 %vm298_vm1, %v272_v22  ;;  %2285 = vmatprep.mubr.msk.f32.mxu0 %vm298_vm1, %v274_v26 }
  0x3f   : > { %2234 = vmatmul.mubr.msk.f32.gmra.mxu1 %vm298_vm1, %v273_v24  ;;  %2286 = vmatmul.mubr.msk.f32.gmra.mxu0 %vm298_vm1, %v275_v28 }
  0x40   : > { %2236 = vmatprep.mubr.msk.f32.mxu1 %vm298_vm1, %v274_v26  ;;  %2288 = vmatprep.mubr.msk.f32.mxu0 %vm298_vm1, %v276_v30 }
  0x43   : > { %2237 = vmatmul.mubr.msk.f32.gmra.mxu1 %vm298_vm1, %v275_v28  ;;  %2289 = vmatmul.mubr.msk.f32.gmra.mxu0 %vm298_vm1, %v277_v32 }
  0x44   : > { %2239 = vmatprep.mubr.msk.f32.mxu1 %vm298_vm1, %v276_v30  ;;  %2291 = vmatprep.mubr.msk.f32.mxu0 %vm298_vm1, %v278_v34 }
  0x47   : > { %2240 = vmatmul.mubr.msk.f32.gmra.mxu1 %vm298_vm1, %v277_v32  ;;  %2292 = vmatmul.mubr.msk.f32.gmra.mxu0 %vm298_vm1, %v279_v36 }
  0x48   : > { %2242 = vmatprep.mubr.msk.f32.mxu1 %vm298_vm1, %v278_v34  ;;  %2294 = vmatprep.mubr.msk.f32.mxu0 %vm298_vm1, %v2455_v5 }
  0x4b   : > { %2243 = vmatmul.mubr.msk.f32.gmra.mxu1 %vm298_vm1, %v279_v36  ;;  %2295 = vmatmul.mubr.msk.f32.gmra.mxu0 %vm298_vm1, %v2462_v7 }
  0x4c   : > { %2245 = vmatprep.mubr.msk.f32.mxu1 %vm298_vm1, %v2455_v5  ;;  %2297 = vmatprep.mubr.msk.f32.mxu0 %vm298_vm1, %v2468_v9 }
  0x4f   : > { %2246 = vmatmul.mubr.msk.f32.gmra.mxu1 %vm298_vm1, %v2462_v7  ;;  %2298 = vmatmul.mubr.msk.f32.gmra.mxu0 %vm298_vm1, %v2483_v13 }
  0x50   : > { %2248 = vmatprep.mubr.msk.f32.mxu1 %vm298_vm1, %v2468_v9  ;;  %2300 = vmatprep.mubr.msk.f32.mxu0 %vm298_vm1, %v2491_v15 }
  0x53   : > { %2249 = vmatmul.mubr.msk.f32.gmra.mxu1 %vm298_vm1, %v2483_v13  ;;  %2301 = vmatmul.mubr.msk.f32.gmra.mxu0 %vm298_vm1, %v2501_v17 }
  0x54   : > { %2251 = vmatprep.mubr.msk.f32.mxu1 %vm298_vm1, %v2491_v15  ;;  %2303 = vmatprep.mubr.msk.f32.mxu0 %vm298_vm1, %v2505_v19 }
  0x57   : > { %2252 = vmatmul.mubr.msk.f32.gmra.mxu1 %vm298_vm1, %v2501_v17  ;;  %2304 = vmatmul.mubr.msk.f32.gmra.mxu0 %vm298_vm1, %v2515_v21 }
  0x58   : > { %2254 = vmatprep.mubr.msk.f32.mxu1 %vm298_vm1, %v2505_v19  ;;  %2306 = vmatprep.mubr.msk.f32.mxu0 %vm298_vm1, %v2519_v23 }
  0x5b   : > { %2255 = vmatmul.mubr.msk.f32.gmra.mxu1 %vm298_vm1, %v2515_v21  ;;  %2307 = vmatmul.mubr.msk.f32.gmra.mxu0 %vm298_vm1, %v2529_v25 }
  0x5c   : > { %2257 = vmatprep.mubr.msk.f32.mxu1 %vm298_vm1, %v2519_v23  ;;  %2309 = vmatprep.mubr.msk.f32.mxu0 %vm298_vm1, %v2533_v27 }
  0x5f   : > { %2258 = vmatmul.mubr.msk.f32.gmra.mxu1 %vm298_vm1, %v2529_v25  ;;  %2310 = vmatmul.mubr.msk.f32.gmra.mxu0 %vm298_vm1, %v2543_v29 }
  0x60   : > { %2260 = vmatprep.mubr.msk.f32.mxu1 %vm298_vm1, %v2533_v27  ;;  %2312 = vmatprep.mubr.msk.f32.mxu0 %vm298_vm1, %v2547_v31 }
  0x63   : > { %2261 = vmatmul.mubr.msk.f32.gmra.mxu1 %vm298_vm1, %v2543_v29  ;;  %2313 = vmatmul.mubr.msk.f32.gmra.mxu0 %vm298_vm1, %v2557_v33 }
  0x64   : > { %2263 = vmatprep.mubr.msk.f32.mxu1 %vm298_vm1, %v2547_v31  ;;  %2315 = vmatprep.mubr.msk.f32.mxu0 %vm298_vm1, %v2561_v35 }
  0x67   : > { %2264 = vmatmul.mubr.msk.f32.gmra.mxu1 %vm298_vm1, %v2557_v33  ;;  %2316 = vmatmul.mubr.msk.f32.gmra.mxu0 %vm298_vm1, %v2571_v37 }
  0x68   : > { %2266 = vmatprep.mubr.msk.f32.mxu1 %vm298_vm1, %v2561_v35  ;;  %2318 = vmatprep.mubr.msk.f32.mxu0 %vm298_vm1, %v1139_v38 }
  0x6b   : > { %2267 = vmatmul.mubr.msk.f32.gmra.mxu1 %vm298_vm1, %v2571_v37  ;;  %2319 = vmatmul.mubr.msk.f32.gmra.mxu0 %vm298_vm1, %v1140_v39 }
  0x6c   : > { %2269 = vmatprep.mubr.msk.f32.mxu1 %vm298_vm1, %v1139_v38  ;;  %2321 = vmatprep.mubr.msk.f32.mxu0 %vm298_vm1, %v1141_v40 }
  0x6f   : > { %2270 = vmatmul.mubr.msk.f32.gmra.mxu1 %vm298_vm1, %v1140_v39  ;;  %2322 = vmatmul.mubr.msk.f32.gmra.mxu0 %vm298_vm1, %v1142_v41 }
  0xd3   : > { %v2174_v42 = vpop.f32.mrf.mxu0  ;;  %v2677_v43 = vpop.f32.mrf.mxu1 }
  0xd5   : > { %v465_v44 = vpop.f32.mrf.mxu0  ;;  %v2679_v45 = vpop.f32.mrf.mxu1 }
  0xd7   : > { %v2177_v46 = vpop.f32.mrf.mxu0  ;;  %v2681_v47 = vpop.f32.mrf.mxu1 }
  0xd9   : > { %v475_v48 = vpop.f32.mrf.mxu0  ;;  %v2683_v49 = vpop.f32.mrf.mxu1 }
  0xdb   : > { %v2180_v50 = vpop.f32.mrf.mxu0  ;;  %v2685_v51 = vpop.f32.mrf.mxu1 }
  0xdd   : > { %v485_v52 = vpop.f32.mrf.mxu0  ;;  %v2687_v53 = vpop.f32.mrf.mxu1 }
  0xdf   : > { %v2183_v54 = vpop.f32.mrf.mxu0  ;;  %v2689_v55 = vpop.f32.mrf.mxu1 }
  0xe1   : > { %v495_v56 = vpop.f32.mrf.mxu0  ;;  %v2691_v57 = vpop.f32.mrf.mxu1 }
  0xe3   : > { %v2693_v58 = vpop.f32.mrf.mxu0  ;;  %v2695_v59 = vpop.f32.mrf.mxu1 }
  0xe5   : > { %v2697_v60 = vpop.f32.mrf.mxu0  ;;  %v2699_v61 = vpop.f32.mrf.mxu1 }
  0xe7   : > { %v2701_v62 = vpop.f32.mrf.mxu0  ;;  %v2703_v63 = vpop.f32.mrf.mxu1 }
  0xe9   : > { %v2705_v0 = vpop.f32.mrf.mxu0  ;;  %v2707_v1 = vpop.f32.mrf.mxu1 }
  0xeb   : > { %v2709_v2 = vpop.f32.mrf.mxu0  ;;  %v2711_v3 = vpop.f32.mrf.mxu1 }
  0xed   : > { %v2713_v4 = vpop.f32.mrf.mxu0  ;;  %v2715_v5 = vpop.f32.mrf.mxu1 }
  0xef   : > { %v2717_v6 = vpop.f32.mrf.mxu0  ;;  %v2719_v7 = vpop.f32.mrf.mxu1 }
  0xf1   : > { %v2721_v8 = vpop.f32.mrf.mxu0  ;;  %v2723_v9 = vpop.f32.mrf.mxu1 }
  0xf3   : > { %v2226_v10 = vpop.f32.mrf.mxu1  ;;  %v2278_v11 = vpop.f32.mrf.mxu0 }
  0xf4   : > { %v1048_v12 = vadd.f32 %v2226_v10, %v2174_v42 }
  0xf5   : > { %v856_v13 = vpop.f32.mrf.mxu1  ;;  %v1311_v14 = vpop.f32.mrf.mxu0 }
  0xf6   : > { %v1047_v15 = vadd.f32 %v856_v13, %v465_v44  ;;  %v2725_v16 = vadd.f32 %v2278_v11, %v1048_v12 }
  0xf7   : > { %v2229_v17 = vpop.f32.mrf.mxu1  ;;  %v2281_v18 = vpop.f32.mrf.mxu0 }
  0xf8   : > { %v2727_v19 = vadd.f32 %v1311_v14, %v1047_v15  ;;  %v1050_v20 = vadd.f32 %v2229_v17, %v2177_v46  ;;  %v1637_v25 = vmul.f32 %v2725_v16, %v2725_v16 }
  0xf9   : > { %v866_v21 = vpop.f32.mrf.mxu1  ;;  %v1321_v22 = vpop.f32.mrf.mxu0 }
  0xfa   : > { %v1636_v23 = vmul.f32 %v2727_v19, %v2727_v19  ;;  %v1049_v24 = vadd.f32 %v866_v21, %v475_v48  ;;  %v1598_v28 = vadd.f32 %v2725_v16, %v2727_v19  ;;  %v2735_v29 = vadd.f32 %v2281_v18, %v1050_v20 }
  0xfb   : > { %v2232_v26 = vpop.f32.mrf.mxu1  ;;  %v2284_v27 = vpop.f32.mrf.mxu0 }
  0xfc   : > { %v2737_v30 = vadd.f32 %v1321_v22, %v1049_v24  ;;  %v1052_v31 = vadd.f32 %v2232_v26, %v2180_v50  ;;  %v1668_v34 = vadd.f32 %v1637_v25, %v1636_v23  ;;  %v1639_v41 = vmul.f32 %v2735_v29, %v2735_v29 }
  0xfd   : > { %v876_v32 = vpop.f32.mrf.mxu1  ;;  %v1331_v33 = vpop.f32.mrf.mxu0 }
  0xfe   : > { %v1599_v35 = vadd.f32 %v1598_v28, %v2737_v30  ;;  %v1638_v36 = vmul.f32 %v2737_v30, %v2737_v30  ;;  %v1051_v37 = vadd.f32 %v876_v32, %v485_v52  ;;  %v2742_v38 = vadd.f32 %v2284_v27, %v1052_v31 }
  0xff   : > { %v2235_v39 = vpop.f32.mrf.mxu1  ;;  %v2287_v40 = vpop.f32.mrf.mxu0 }
 0x100   : > { %v1669_v42 = vadd.f32 %v1668_v34, %v1638_v36  ;;  %v2746_v44 = vadd.f32 %v1331_v33, %v1051_v37  ;;  %v1600_v46 = vadd.f32 %v1599_v35, %v2735_v29  ;;  %v1054_v48 = vadd.f32 %v2235_v39, %v2183_v54 }
 0x101   : > { %v886_v50 = vpop.f32.mrf.mxu1  ;;  %v1341_v10 = vpop.f32.mrf.mxu0  ;;  %v1641_v14 = vmul.f32 %v2742_v38, %v2742_v38 }
 0x102   : > { %v1601_v11 = vadd.f32 %v1600_v46, %v2746_v44  ;;  %v1640_v52 = vmul.f32 %v2746_v44, %v2746_v44  ;;  %v1670_v12 = vadd.f32 %v1669_v42, %v1639_v41  ;;  %v1053_v13 = vadd.f32 %v886_v50, %v495_v56 }
 0x103   : > { %v2754_v15 = vadd.f32 %v2287_v40, %v1054_v48  ;;  %v2238_v17 = vpop.f32.mrf.mxu1  ;;  %v2290_v18 = vpop.f32.mrf.mxu0 }
 0x104   : > { %v1671_v20 = vadd.f32 %v1670_v12, %v1640_v52  ;;  %v2756_v21 = vadd.f32 %v1341_v10, %v1053_v13  ;;  %v1602_v54 = vadd.f32 %v1601_v11, %v2742_v38  ;;  %v1056_v22 = vadd.f32 %v2238_v17, %v2693_v58 }
 0x105   : > { %v896_v23 = vpop.f32.mrf.mxu1  ;;  %v1351_v24 = vpop.f32.mrf.mxu0  ;;  %v1643_v32 = vmul.f32 %v2754_v15, %v2754_v15 }
 0x106   : > { %v1603_v25 = vadd.f32 %v1602_v54, %v2756_v21  ;;  %v1642_v56 = vmul.f32 %v2756_v21, %v2756_v21  ;;  %v1672_v26 = vadd.f32 %v1671_v20, %v1641_v14  ;;  %v1055_v27 = vadd.f32 %v896_v23, %v2697_v60 }
 0x107   : > { %v2241_v28 = vpop.f32.mrf.mxu1  ;;  %v2293_v31 = vpop.f32.mrf.mxu0  ;;  %v2766_v34 = vadd.f32 %v2290_v18, %v1056_v22 }
 0x108   : > { %v1673_v33 = vadd.f32 %v1672_v26, %v1642_v56  ;;  %v1604_v58 = vadd.f32 %v1603_v25, %v2754_v15  ;;  %v2769_v35 = vadd.f32 %v1351_v24, %v1055_v27  ;;  %v1058_v36 = vadd.f32 %v2241_v28, %v2701_v62 }
 0x109   : > { %v906_v37 = vpop.f32.mrf.mxu1  ;;  %v1361_v39 = vpop.f32.mrf.mxu0  ;;  %v1645_v50 = vmul.f32 %v2766_v34, %v2766_v34 }
 0x10a   : > { %v1674_v40 = vadd.f32 %v1673_v33, %v1643_v32  ;;  %v1057_v41 = vadd.f32 %v906_v37, %v2705_v0  ;;  %v1605_v60 = vadd.f32 %v1604_v58, %v2769_v35  ;;  %v1644_v42 = vmul.f32 %v2769_v35, %v2769_v35 }
 0x10b   : > { %v2244_v46 = vpop.f32.mrf.mxu1  ;;  %v2296_v48 = vpop.f32.mrf.mxu0  ;;  %v2780_v52 = vadd.f32 %v2293_v31, %v1058_v36 }
 0x10c   : > { %v2778_v10 = vadd.f32 %v1361_v39, %v1057_v41  ;;  %v1675_v11 = vadd.f32 %v1674_v40, %v1644_v42  ;;  %v1606_v62 = vadd.f32 %v1605_v60, %v2766_v34  ;;  %v1060_v12 = vadd.f32 %v2244_v46, %v2709_v2 }
 0x10d   : > { %v916_v0 = vpop.f32.mrf.mxu1  ;;  %v1371_v13 = vpop.f32.mrf.mxu0  ;;  %v1647_v25 = vmul.f32 %v2780_v52, %v2780_v52 }
 0x10e   : > { %v1646_v14 = vmul.f32 %v2778_v10, %v2778_v10  ;;  %v1059_v17 = vadd.f32 %v916_v0, %v2713_v4  ;;  %v1607_v18 = vadd.f32 %v1606_v62, %v2778_v10  ;;  %v1676_v20 = vadd.f32 %v1675_v11, %v1645_v50 }
 0x10f   : > { %v2247_v54 = vpop.f32.mrf.mxu1  ;;  %v2299_v22 = vpop.f32.mrf.mxu0  ;;  %v2793_v56 = vadd.f32 %v2296_v48, %v1060_v12 }
 0x110   : > { %v2788_v23 = vadd.f32 %v1371_v13, %v1059_v17  ;;  %v1062_v24 = vadd.f32 %v2247_v54, %v2717_v6  ;;  %v1677_v2 = vadd.f32 %v1676_v20, %v1646_v14  ;;  %v1608_v26 = vadd.f32 %v1607_v18, %v2780_v52 }
 0x111   : > { %v926_v27 = vpop.f32.mrf.mxu1  ;;  %v1381_v28 = vpop.f32.mrf.mxu0  ;;  %v1649_v39 = vmul.f32 %v2793_v56, %v2793_v56 }
 0x112   : > { %v1648_v4 = vmul.f32 %v2788_v23, %v2788_v23  ;;  %v1061_v31 = vadd.f32 %v926_v27, %v2721_v8  ;;  %v1609_v32 = vadd.f32 %v1608_v26, %v2788_v23  ;;  %v1678_v33 = vadd.f32 %v1677_v2, %v1647_v25 }
 0x113   : > { %v2250_v58 = vpop.f32.mrf.mxu1  ;;  %v2302_v6 = vpop.f32.mrf.mxu0  ;;  %v2800_v36 = vadd.f32 %v2299_v22, %v1062_v24 }
 0x114   : > { %v2802_v37 = vadd.f32 %v1381_v28, %v1061_v31  ;;  %v1679_v40 = vadd.f32 %v1678_v33, %v1648_v4  ;;  %v1610_v41 = vadd.f32 %v1609_v32, %v2793_v56  ;;  %v1064_v60 = vadd.f32 %v2250_v58, %v2677_v43 }
 0x115   : > { %v936_v42 = vpop.f32.mrf.mxu1  ;;  %v1391_v46 = vpop.f32.mrf.mxu0  ;;  %v1651_v0 = vmul.f32 %v2800_v36, %v2800_v36 }
 0x116   : > { %v1650_v8 = vmul.f32 %v2802_v37, %v2802_v37  ;;  %v1063_v48 = vadd.f32 %v936_v42, %v2679_v45  ;;  %v1611_v50 = vadd.f32 %v1610_v41, %v2802_v37  ;;  %v1680_v11 = vadd.f32 %v1679_v40, %v1649_v39 }
 0x117   : > { %v2253_v62 = vpop.f32.mrf.mxu1  ;;  %v2305_v12 = vpop.f32.mrf.mxu0  ;;  %v2816_v17 = vadd.f32 %v2302_v6, %v1064_v60 }
 0x118   : > { %v2814_v13 = vadd.f32 %v1391_v46, %v1063_v48  ;;  %v1681_v14 = vadd.f32 %v1680_v11, %v1650_v8  ;;  %v1612_v43 = vadd.f32 %v1611_v50, %v2800_v36  ;;  %v1066_v18 = vadd.f32 %v2253_v62, %v2681_v47 }
 0x119   : > { %v946_v20 = vpop.f32.mrf.mxu1  ;;  %v1401_v54 = vpop.f32.mrf.mxu0  ;;  %v1653_v4 = vmul.f32 %v2816_v17, %v2816_v17 }
 0x11a   : > { %v1652_v45 = vmul.f32 %v2814_v13, %v2814_v13  ;;  %v1065_v22 = vadd.f32 %v946_v20, %v2683_v49  ;;  %v1613_v24 = vadd.f32 %v1612_v43, %v2814_v13  ;;  %v1682_v25 = vadd.f32 %v1681_v14, %v1651_v0 }
 0x11b   : > { %v2256_v2 = vpop.f32.mrf.mxu1  ;;  %v2308_v26 = vpop.f32.mrf.mxu0  ;;  %v2829_v31 = vadd.f32 %v2305_v12, %v1066_v18 }
 0x11c   : > { %v2824_v27 = vadd.f32 %v1401_v54, %v1065_v22  ;;  %v1068_v28 = vadd.f32 %v2256_v2, %v2685_v51  ;;  %v1683_v47 = vadd.f32 %v1682_v25, %v1652_v45  ;;  %v1614_v32 = vadd.f32 %v1613_v24, %v2816_v17 }
 0x11d   : > { %v956_v33 = vpop.f32.mrf.mxu1  ;;  %v1411_v58 = vpop.f32.mrf.mxu0  ;;  %v1655_v46 = vmul.f32 %v2829_v31, %v2829_v31 }
 0x11e   : > { %v1654_v49 = vmul.f32 %v2824_v27, %v2824_v27  ;;  %v1067_v6 = vadd.f32 %v956_v33, %v2687_v53  ;;  %v1615_v39 = vadd.f32 %v1614_v32, %v2824_v27  ;;  %v1684_v40 = vadd.f32 %v1683_v47, %v1653_v4 }
 0x11f   : > { %v2259_v41 = vpop.f32.mrf.mxu1  ;;  %v2311_v51 = vpop.f32.mrf.mxu0  ;;  %v2836_v60 = vadd.f32 %v2308_v26, %v1068_v28 }
 0x120   : > { %v2838_v42 = vadd.f32 %v1411_v58, %v1067_v6  ;;  %v1685_v8 = vadd.f32 %v1684_v40, %v1654_v49  ;;  %v1616_v48 = vadd.f32 %v1615_v39, %v2829_v31  ;;  %v1070_v50 = vadd.f32 %v2259_v41, %v2689_v55 }
 0x121   : > { %v966_v11 = vpop.f32.mrf.mxu1  ;;  %v1421_v62 = vpop.f32.mrf.mxu0  ;;  %v1657_v20 = vmul.f32 %v2836_v60, %v2836_v60 }
 0x122   : > { %v1656_v53 = vmul.f32 %v2838_v42, %v2838_v42  ;;  %v1069_v12 = vadd.f32 %v966_v11, %v2691_v57  ;;  %v1617_v0 = vadd.f32 %v1616_v48, %v2838_v42  ;;  %v1686_v14 = vadd.f32 %v1685_v8, %v1655_v46 }
 0x123   : > { %v2262_v43 = vpop.f32.mrf.mxu1  ;;  %v2314_v18 = vpop.f32.mrf.mxu0  ;;  %v2852_v22 = vadd.f32 %v2311_v51, %v1070_v50 }
 0x124   : > { %v2850_v54 = vadd.f32 %v1421_v62, %v1069_v12  ;;  %v1687_v45 = vadd.f32 %v1686_v14, %v1656_v53  ;;  %v1618_v55 = vadd.f32 %v1617_v0, %v2836_v60  ;;  %v1072_v24 = vadd.f32 %v2262_v43, %v2695_v59 }
 0x125   : > { %v976_v25 = vpop.f32.mrf.mxu1  ;;  %v1431_v2 = vpop.f32.mrf.mxu0  ;;  %v1659_v49 = vmul.f32 %v2852_v22, %v2852_v22 }
 0x126   : > { %v1658_v57 = vmul.f32 %v2850_v54, %v2850_v54  ;;  %v1071_v26 = vadd.f32 %v976_v25, %v2699_v61  ;;  %v1619_v28 = vadd.f32 %v1618_v55, %v2850_v54  ;;  %v1688_v4 = vadd.f32 %v1687_v45, %v1657_v20 }
 0x127   : > { %v2265_v47 = vpop.f32.mrf.mxu1  ;;  %v2317_v32 = vpop.f32.mrf.mxu0  ;;  %v2865_v6 = vadd.f32 %v2314_v18, %v1072_v24 }
 0x128   : > { %v2860_v33 = vadd.f32 %v1431_v2, %v1071_v26  ;;  %v1074_v58 = vadd.f32 %v2265_v47, %v2703_v63  ;;  %v1689_v59 = vadd.f32 %v1688_v4, %v1658_v57  ;;  %v1620_v39 = vadd.f32 %v1619_v28, %v2852_v22 }
 0x129   : > { %v986_v40 = vpop.f32.mrf.mxu1  ;;  %v1441_v41 = vpop.f32.mrf.mxu0  ;;  %v1661_v62 = vmul.f32 %v2865_v6, %v2865_v6 }
 0x12a   : > { %v1660_v61 = vmul.f32 %v2860_v33, %v2860_v33  ;;  %v1073_v51 = vadd.f32 %v986_v40, %v2707_v1  ;;  %v1621_v46 = vadd.f32 %v1620_v39, %v2860_v33  ;;  %v1690_v8 = vadd.f32 %v1689_v59, %v1659_v49 }
 0x12b   : > { %v2268_v48 = vpop.f32.mrf.mxu1  ;;  %v2320_v63 = vpop.f32.mrf.mxu0  ;;  %v2872_v50 = vadd.f32 %v2317_v32, %v1074_v58 }
 0x12c   : > { %v2874_v11 = vadd.f32 %v1441_v41, %v1073_v51  ;;  %v1691_v53 = vadd.f32 %v1690_v8, %v1660_v61  ;;  %v1622_v12 = vadd.f32 %v1621_v46, %v2865_v6  ;;  %v1076_v0 = vadd.f32 %v2268_v48, %v2711_v3 }
 0x12d   : > { %v996_v14 = vpop.f32.mrf.mxu1  ;;  %v1451_v43 = vpop.f32.mrf.mxu0  ;;  %v1663_v25 = vmul.f32 %v2872_v50, %v2872_v50 }
 0x12e   : > { %v1662_v1 = vmul.f32 %v2874_v11, %v2874_v11  ;;  %v1075_v18 = vadd.f32 %v996_v14, %v2715_v5  ;;  %v1623_v20 = vadd.f32 %v1622_v12, %v2874_v11  ;;  %v1692_v45 = vadd.f32 %v1691_v53, %v1661_v62 }
 0x12f   : > { %v2271_v55 = vpop.f32.mrf.mxu1  ;;  %v2323_v24 = vpop.f32.mrf.mxu0  ;;  %v2888_v26 = vadd.f32 %v2320_v63, %v1076_v0 }
 0x130   : > { %v2886_v2 = vadd.f32 %v1451_v43, %v1075_v18  ;;  %v1693_v57 = vadd.f32 %v1692_v45, %v1662_v1  ;;  %v1624_v3 = vadd.f32 %v1623_v20, %v2872_v50  ;;  %v1078_v28 = vadd.f32 %v2271_v55, %v2719_v7 }
 0x131   : > { %v1006_v4 = vpop.f32.mrf.mxu1  ;;  %v1461_v49 = vpop.f32.mrf.mxu0  ;;  %v1665_v39 = vmul.f32 %v2888_v26, %v2888_v26 }
 0x132   : > { %v1664_v5 = vmul.f32 %v2886_v2, %v2886_v2  ;;  %v1077_v47 = vadd.f32 %v1006_v4, %v2723_v9  ;;  %v1625_v32 = vadd.f32 %v1624_v3, %v2886_v2  ;;  %v1694_v58 = vadd.f32 %v1693_v57, %v1663_v25 }
 0x133   : > { %v2900_v41 = vadd.f32 %v2323_v24, %v1078_v28 }
 0x134   : > { %v2896_v59 = vadd.f32 %v1461_v49, %v1077_v47  ;;  %v1695_v40 = vadd.f32 %v1694_v58, %v1664_v5  ;;  %v1626_v7 = vadd.f32 %v1625_v32, %v2888_v26  ;;  %v1717_v47 = vlaneseq  ;;  %v1711_v58 = vld [vmem:[%s3033_s3] sm:$0x1] }
 0x135   : > { %v1667_v46 = vmul.f32 %v2900_v41, %v2900_v41 }
 0x136   : > { %v1666_v61 = vmul.f32 %v2896_v59, %v2896_v59  ;;  %v1627_v51 = vadd.f32 %v1626_v7, %v2896_v59  ;;  %v1696_v9 = vadd.f32 %v1695_v40, %v1665_v39  ;;  %v1718_v32 = vshrl.u32 %v1717_v47, 7  ;;  %v1713_v7 = vld [vmem:[%s3034_s4] sm:$0x1] }
 0x138   : > { %v1628_v8 = vadd.f32 %v1627_v51, %v2900_v41  ;;  %v1697_v48 = vadd.f32 %v1696_v9, %v1666_v61  ;;  %v1719_v49 = vsub.s32 0, %v1718_v32 }
 0x13a   : > { %v1629_v63 = vrot.slane %v1628_v8, 4  ;;  %v1698_v62 = vadd.f32 %v1697_v48, %v1667_v46 }
 0x13c   : > { %v1630_v53 = vadd.f32 %v1629_v63, %v1628_v8  ;;  %v1699_v12 = vrot.slane %v1698_v62, 4 }
 0x13e   : > { %v1631_v0 = vrot.slane %v1630_v53, 2  ;;  %v1700_v14 = vadd.f32 %v1699_v12, %v1698_v62 }
 0x140   : > { %v1632_v43 = vadd.f32 %v1631_v0, %v1630_v53  ;;  %v1701_v1 = vrot.slane %v1700_v14, 2 }
 0x142   : > { %v1633_v18 = vrot.slane %v1632_v43, 1  ;;  %v1702_v20 = vadd.f32 %v1701_v1, %v1700_v14 }
 0x144   : > { %v1634_v45 = vadd.f32 %v1633_v18, %v1632_v43  ;;  %v1703_v55 = vrot.slane %v1702_v20, 1 }
 0x146   : > { %v1635_v24 = vmul.f32 0.00390625, %v1634_v45  ;;  %v1704_v25 = vadd.f32 %v1703_v55, %v1702_v20 }
 0x148   : > { %v1705_v57 = vmul.f32 0.00390625, %v1704_v25  ;;  %v1706_v3 = vmul.f32 %v1635_v24, %v1635_v24 }
 0x14a   : > { %v1707_v28 = vsub.f32 %v1705_v57, %v1706_v3 }
 0x14c   : > { %v1708_v4 = vmax.f32 %v1707_v28, 0.0 }
 0x14e   : > { %v1709_v5 = vadd.f32 1e-05, %v1708_v4 }
 0x150   : > { %2353 = vrsqrt.f32 %v1709_v5 }
 0x15d   : > { %v2354_v39 = vpop.eup %2353 }
 0x15e   : > { %v1712_v40 = vmul.f32 %v2354_v39, %v1711_v58 }
 0x160   : > { %v1714_v61 = vmul.f32 %v1712_v40, %v1635_v24  ;;  %v1720_v51 = vrot.slane %v1712_v40, %v1719_v49 }
 0x162   : > { %v1715_v9 = vsub.f32 %v1713_v7, %v1714_v61  ;;  %v1722_v46 = vmul.f32 %v1720_v51, %v2727_v19  ;;  %v1723_v8 = vmul.f32 %v1720_v51, %v2725_v16  ;;  %v1724_v48 = vmul.f32 %v1720_v51, %v2737_v30 }
 0x163   : > { %v1725_v63 = vmul.f32 %v1720_v51, %v2735_v29  ;;  %v1726_v62 = vmul.f32 %v1720_v51, %v2746_v44  ;;  %v1727_v53 = vmul.f32 %v1720_v51, %v2742_v38  ;;  %v1728_v12 = vmul.f32 %v1720_v51, %v2756_v21 }
 0x164   : > { %v1729_v0 = vmul.f32 %v1720_v51, %v2754_v15  ;;  %v1730_v14 = vmul.f32 %v1720_v51, %v2769_v35  ;;  %v1731_v43 = vmul.f32 %v1720_v51, %v2766_v34  ;;  %v1732_v19 = vmul.f32 %v1720_v51, %v2778_v10 }
 0x165   : > { %v1733_v16 = vmul.f32 %v1720_v51, %v2780_v52  ;;  %v1734_v30 = vmul.f32 %v1720_v51, %v2788_v23  ;;  %v1735_v29 = vmul.f32 %v1720_v51, %v2793_v56  ;;  %v1736_v44 = vmul.f32 %v1720_v51, %v2802_v37 }
 0x166   : > { %v1737_v38 = vmul.f32 %v1720_v51, %v2800_v36  ;;  %v1738_v21 = vmul.f32 %v1720_v51, %v2814_v13  ;;  %v1739_v15 = vmul.f32 %v1720_v51, %v2816_v17  ;;  %v1746_v35 = vmul.f32 %v1720_v51, %v2860_v33 }
 0x167   : > { %v1747_v34 = vmul.f32 %v1720_v51, %v2865_v6  ;;  %v1748_v10 = vmul.f32 %v1720_v51, %v2874_v11  ;;  %v1749_v52 = vmul.f32 %v1720_v51, %v2872_v50  ;;  %v1750_v23 = vmul.f32 %v1720_v51, %v2886_v2 }
 0x168   : > { %v1751_v56 = vmul.f32 %v1720_v51, %v2888_v26  ;;  %v1752_v37 = vmul.f32 %v1720_v51, %v2896_v59  ;;  %v1740_v36 = vmul.f32 %v1720_v51, %v2824_v27  ;;  %v1741_v13 = vmul.f32 %v1720_v51, %v2829_v31 }
 0x169   : > { %v1753_v17 = vmul.f32 %v1720_v51, %v2900_v41  ;;  %v1758_v1 = vrot.slane %v1715_v9, %v1719_v49  ;;  %v1742_v33 = vmul.f32 %v1720_v51, %v2838_v42  ;;  %v1743_v6 = vmul.f32 %v1720_v51, %v2836_v60 }
 0x16a   : > { %v1744_v11 = vmul.f32 %v1720_v51, %v2850_v54  ;;  %v1745_v50 = vmul.f32 %v1720_v51, %v2852_v22 }
 0x16b   : > { %v1760_v2 = vadd.f32 %v1758_v1, %v1722_v46  ;;  %v1761_v26 = vadd.f32 %v1758_v1, %v1723_v8  ;;  %v1762_v18 = vadd.f32 %v1758_v1, %v1724_v48  ;;  %v1763_v59 = vadd.f32 %v1758_v1, %v1725_v63 }
 0x16c   : > { %v1764_v20 = vadd.f32 %v1758_v1, %v1726_v62  ;;  %v1765_v27 = vadd.f32 %v1758_v1, %v1727_v53  ;;  %v1766_v45 = vadd.f32 %v1758_v1, %v1728_v12  ;;  %v1767_v31 = vadd.f32 %v1758_v1, %v1729_v0 }
 0x16d   : > { %v1768_v55 = vadd.f32 %v1758_v1, %v1730_v14  ;;  %v1769_v41 = vadd.f32 %v1758_v1, %v1731_v43  ;;  %v1770_v24 = vadd.f32 %v1758_v1, %v1732_v19  ;;  %v1771_v25 = vadd.f32 %v1758_v1, %v1733_v16 }
 0x16e   : > { %v1772_v42 = vadd.f32 %v1758_v1, %v1734_v30  ;;  %v1773_v57 = vadd.f32 %v1758_v1, %v1735_v29  ;;  %v1774_v60 = vadd.f32 %v1758_v1, %v1736_v44  ;;  %v1775_v3 = vadd.f32 %v1758_v1, %v1737_v38 }
 0x16f   : > { %v1776_v54 = vadd.f32 %v1758_v1, %v1738_v21  ;;  %v1777_v22 = vadd.f32 %v1758_v1, %v1739_v15  ;;  %v1778_v28 = vadd.f32 %v1758_v1, %v1740_v36  ;;  %v1779_v4 = vadd.f32 %v1758_v1, %v1741_v13 }
 0x170   : > { %v2948_v5 = vadd.f32 %v1758_v1, %v1742_v33  ;;  %v2950_v47 = vadd.f32 %v1758_v1, %v1743_v6  ;;  %v2952_v32 = vadd.f32 %v1758_v1, %v1744_v11  ;;  %v2954_v58 = vadd.f32 %v1758_v1, %v1745_v50 }
 0x171   : > { %v2956_v49 = vadd.f32 %v1758_v1, %v1746_v35  ;;  %v2958_v39 = vadd.f32 %v1758_v1, %v1747_v34  ;;  %v2960_v40 = vadd.f32 %v1758_v1, %v1748_v10  ;;  %v2962_v7 = vadd.f32 %v1758_v1, %v1749_v52 }
 0x172   : > { %v2969_v61 = vadd.f32 %v1758_v1, %v1750_v23  ;;  %v2971_v51 = vadd.f32 %v1758_v1, %v1751_v56  ;;  %v2973_v9 = vadd.f32 %v1758_v1, %v1752_v37  ;;  %v2975_v46 = vadd.f32 %v1758_v1, %v1753_v17 }
 0x173   : > { %v1792_v8 = vmax.f32 %v1760_v2, 0.0  ;;  %v1793_v48 = vmax.f32 %v1761_v26, 0.0  ;;  %v1794_v63 = vmax.f32 %v1762_v18, 0.0  ;;  %v1795_v62 = vmax.f32 %v1763_v59, 0.0 }
 0x174   : > { %v1796_v53 = vmax.f32 %v1764_v20, 0.0  ;;  %v1797_v12 = vmax.f32 %v1765_v27, 0.0  ;;  %v1798_v0 = vmax.f32 %v1766_v45, 0.0  ;;  %v1799_v14 = vmax.f32 %v1767_v31, 0.0 }
 0x175   : > { %v1800_v43 = vmax.f32 %v1768_v55, 0.0  ;;  %v1801_v19 = vmax.f32 %v1769_v41, 0.0  ;;  %v1802_v16 = vmax.f32 %v1770_v24, 0.0  ;;  %v1803_v30 = vmax.f32 %v1771_v25, 0.0  ;;  %1824 = vst [vmem:[%s2967_s21] sm:$0xff] %v1792_v8  ;;  %1825 = vst [vmem:[%s2967_s21 + $0x8] sm:$0xff] %v1793_v48 }
 0x176   : > { %1826 = vst [vmem:[%s2967_s21 + $0x10] sm:$0xff] %v1794_v63  ;;  %1827 = vst [vmem:[%s2967_s21 + $0x18] sm:$0xff] %v1795_v62  ;;  %v1804_v29 = vmax.f32 %v1772_v42, 0.0  ;;  %v1805_v44 = vmax.f32 %v1773_v57, 0.0  ;;  %v1806_v38 = vmax.f32 %v1774_v60, 0.0  ;;  %v1807_v21 = vmax.f32 %v1775_v3, 0.0 }
 0x177   : > { %1828 = vst [vmem:[%s2967_s21 + $0x20] sm:$0xff] %v1796_v53  ;;  %1829 = vst [vmem:[%s2967_s21 + $0x28] sm:$0xff] %v1797_v12  ;;  %v1808_v15 = vmax.f32 %v1776_v54, 0.0  ;;  %v1809_v35 = vmax.f32 %v1777_v22, 0.0  ;;  %v1810_v34 = vmax.f32 %v1778_v28, 0.0  ;;  %v1811_v10 = vmax.f32 %v1779_v4, 0.0 }
 0x178   : > { %1830 = vst [vmem:[%s2967_s21 + $0x30] sm:$0xff] %v1798_v0  ;;  %1831 = vst [vmem:[%s2967_s21 + $0x38] sm:$0xff] %v1799_v14  ;;  %v1812_v52 = vmax.f32 %v2948_v5, 0.0  ;;  %v1813_v23 = vmax.f32 %v2950_v47, 0.0  ;;  %v1814_v56 = vmax.f32 %v2952_v32, 0.0  ;;  %v1815_v37 = vmax.f32 %v2954_v58, 0.0 }
 0x179   : > { %1832 = vst [vmem:[%s2967_s21 + $0x40] sm:$0xff] %v1800_v43  ;;  %1833 = vst [vmem:[%s2967_s21 + $0x48] sm:$0xff] %v1801_v19  ;;  %v1816_v36 = vmax.f32 %v2956_v49, 0.0  ;;  %v1817_v13 = vmax.f32 %v2958_v39, 0.0  ;;  %v1818_v17 = vmax.f32 %v2960_v40, 0.0  ;;  %v1819_v1 = vmax.f32 %v2962_v7, 0.0 }
 0x17a   : > { %1834 = vst [vmem:[%s2967_s21 + $0x50] sm:$0xff] %v1802_v16  ;;  %1835 = vst [vmem:[%s2967_s21 + $0x58] sm:$0xff] %v1803_v30  ;;  %v1820_v33 = vmax.f32 %v2969_v61, 0.0  ;;  %v1821_v6 = vmax.f32 %v2971_v51, 0.0  ;;  %v1822_v11 = vmax.f32 %v2973_v9, 0.0  ;;  %v1823_v50 = vmax.f32 %v2975_v46, 0.0 }
 0x17b   : > { %1836 = vst [vmem:[%s2967_s21 + $0x60] sm:$0xff] %v1804_v29  ;;  %1837 = vst [vmem:[%s2967_s21 + $0x68] sm:$0xff] %v1805_v44 }
 0x17c   : > { %1838 = vst [vmem:[%s2967_s21 + $0x70] sm:$0xff] %v1806_v38  ;;  %1839 = vst [vmem:[%s2967_s21 + $0x78] sm:$0xff] %v1807_v21 }
 0x17d   : > { %1840 = vst [vmem:[%s2967_s21 + $0x80] sm:$0xff] %v1808_v15  ;;  %1841 = vst [vmem:[%s2967_s21 + $0x88] sm:$0xff] %v1809_v35 }
 0x17e   : > { %1842 = vst [vmem:[%s2967_s21 + $0x90] sm:$0xff] %v1810_v34  ;;  %1843 = vst [vmem:[%s2967_s21 + $0x98] sm:$0xff] %v1811_v10 }
 0x17f   : > { %1844 = vst [vmem:[%s2967_s21 + $0xa0] sm:$0xff] %v1812_v52  ;;  %1845 = vst [vmem:[%s2967_s21 + $0xa8] sm:$0xff] %v1813_v23 }
 0x180   : > { %1846 = vst [vmem:[%s2967_s21 + $0xb0] sm:$0xff] %v1814_v56  ;;  %1847 = vst [vmem:[%s2967_s21 + $0xb8] sm:$0xff] %v1815_v37 }
 0x181   : > { %1848 = vst [vmem:[%s2967_s21 + $0xc0] sm:$0xff] %v1816_v36  ;;  %1849 = vst [vmem:[%s2967_s21 + $0xc8] sm:$0xff] %v1817_v13 }
 0x182   : > { %1850 = vst [vmem:[%s2967_s21 + $0xd0] sm:$0xff] %v1818_v17  ;;  %1851 = vst [vmem:[%s2967_s21 + $0xd8] sm:$0xff] %v1819_v1 }
 0x183   : > { %1852 = vst [vmem:[%s2967_s21 + $0xe0] sm:$0xff] %v1820_v33  ;;  %1853 = vst [vmem:[%s2967_s21 + $0xe8] sm:$0xff] %v1821_v6 }
 0x184   : > { %1854 = vst [vmem:[%s2967_s21 + $0xf0] sm:$0xff] %v1822_v11  ;;  %1855 = vst [vmem:[%s2967_s21 + $0xf8] sm:$0xff] %v1823_v50 }
 0x185 PF: > { %s15_s20 = sadd.s32 1, %s2377_s20   ;;  %s3036_s18 = smov %s2373_s19 }
 0x186   : > { %p12_p5 = scmp.ge.s32.totalorder %s15_s20, 4   ;;  %s3037_s19 = smov %s3039_s2 }
 0x188   :  { %14 = sbr.rel (!%p12_p5) target bundleno = 2 (0x2), region = 72 }

</bundles_post_ra>
